<compile_context>
chip_gen: v5e
topology: v5e:2x2
jax: 0.10.0
libtpu: 0.0.40
codegen_flags: <defaults>
</compile_context>

<pallas_src>
import functools

import jax
import jax.numpy as jnp
from jax.experimental import pallas as pl
from jax.experimental.pallas import tpu as pltpu

LANE = 128
SUBLANE = 8


def _round_up(x, m):
    return ((x + m - 1) // m) * m


# ---------------------------------------------------------------------------
# Kernel
# ---------------------------------------------------------------------------
def encoder_kernel(x_ref, w1_ref, b1_ref, w2_ref, b2_ref, out_ref):
    # hidden = relu(x @ W1 + b1): bf16 (or f32) operands, f32 MXU accumulation,
    # bias + ReLU on the f32 accumulator (VPU).
    h = jnp.dot(x_ref[...], w1_ref[...], preferred_element_type=jnp.float32)
    h = jnp.maximum(h + b1_ref[...], 0.0)
    # Fused latent heads: [TB, out_p] = h @ [hid_p, out_p]  (out_p = pad(2*latent)).
    out = jnp.dot(h.astype(w2_ref.dtype), w2_ref[...],
                  preferred_element_type=jnp.float32)
    out_ref[...] = (out + b2_ref[...]).astype(out_ref.dtype)


# ---------------------------------------------------------------------------
# One-time parameter preparation (outside the forward path)
# ---------------------------------------------------------------------------
def prepare_encoder_params(w1, b1, wmu, bmu, wvar, bvar,
                           compute_dtype=jnp.bfloat16):
    """Fuse the mu/var heads and lane-pad all feature dims to multiples of 128.

    Weights are given PRE-TRANSPOSED relative to nn.Linear storage:
      w1 [input_dim, hidden_dim], wmu/wvar [hidden_dim, latent_dim]
    so that y = x @ w + b matches PyTorch's y = x @ W.T + b exactly.
    Zero-padding is mathematically inert: padded x columns hit zero W1 rows,
    padded hidden lanes are relu(0)=0 and hit zero W2 rows, padded output lanes
    are sliced off in the wrapper.
    """
    input_dim, hidden_dim = w1.shape
    latent_dim = wmu.shape[1]
    in_p = _round_up(input_dim, LANE)
    hid_p = _round_up(hidden_dim, LANE)
    out_p = _round_up(2 * latent_dim, LANE)

    w1_p = jnp.zeros((in_p, hid_p), compute_dtype)
    w1_p = w1_p.at[:input_dim, :hidden_dim].set(w1.astype(compute_dtype))
    b1_p = jnp.zeros((1, hid_p), jnp.float32)
    b1_p = b1_p.at[0, :hidden_dim].set(b1.astype(jnp.float32))

    w2 = jnp.concatenate([wmu, wvar], axis=1)            # [hidden, 2*latent]
    b2 = jnp.concatenate([bmu, bvar], axis=0)            # [2*latent]
    w2_p = jnp.zeros((hid_p, out_p), compute_dtype)
    w2_p = w2_p.at[:hidden_dim, :2 * latent_dim].set(w2.astype(compute_dtype))
    b2_p = jnp.zeros((1, out_p), jnp.float32)
    b2_p = b2_p.at[0, :2 * latent_dim].set(b2.astype(jnp.float32))

    return dict(w1=w1_p, b1=b1_p, w2=w2_p, b2=b2_p,
                latent_dim=latent_dim, input_dim=input_dim)


# ---------------------------------------------------------------------------
# Tiling / VMEM planning
# ---------------------------------------------------------------------------
def _vmem_capacity_bytes():
    try:
        return int(pltpu.get_tpu_info().vmem_capacity_bytes)
    except Exception:
        return 64 << 20          # assume the smallest (v7x per-TC) if query fails


def _plan_tiles(batch, in_p, hid_p, out_p, x_bytes, w_bytes):
    cap = _vmem_capacity_bytes()
    budget = int(cap * 0.75)     # headroom for Mosaic internal scratch / spills

    # Resident weights + biases; counted 2x in case the constant-index blocks are
    # still double-buffered by the pipeliner.
    weight_bytes = (2 * (in_p * hid_p + hid_p * out_p) * w_bytes
                    + 2 * (hid_p + out_p) * 4)

    # Per batch-row footprint: double-buffered x and f32 out tiles, f32 hidden
    # intermediate, its compute-dtype copy fed to the 2nd GEMM, f32 out accumulator.
    per_row = (2 * in_p * x_bytes + 2 * out_p * 4
               + hid_p * 4 + hid_p * w_bytes + out_p * 4)

    if batch <= SUBLANE:
        tb = batch                                   # full-dim block is always legal
    else:
        # Aim for >= 2 grid steps (v7x megacore), tile rows multiple of 8, cap 1024
        # (128 MiB parts benefit from big tiles; the VMEM loop shrinks it on v7x).
        tb = min(1024, _round_up(pl.cdiv(batch, 2), SUBLANE))
        avail = max(budget - weight_bytes, per_row * SUBLANE)
        while tb > SUBLANE and tb * per_row > avail:
            tb = max(SUBLANE, _round_up(tb // 2, SUBLANE))

    vmem_limit = weight_bytes + tb * per_row + (4 << 20)
    vmem_limit = int(min(max(vmem_limit, 16 << 20), budget))
    return tb, vmem_limit


# ---------------------------------------------------------------------------
# Forward
# ---------------------------------------------------------------------------
@functools.partial(jax.jit, static_argnames=("latent_dim",))
def _encoder_forward_padded(x, w1, b1, w2, b2, *, latent_dim):
    B = x.shape[0]
    in_p, hid_p = w1.shape
    out_p = w2.shape[1]
    compute_dtype = w1.dtype

    # Cast + lane-pad the activations in the wrapper: halves HBM DMA bytes for
    # bf16 and keeps every DMA (8,128)-aligned.
    x_c = x.astype(compute_dtype)
    if x.shape[1] != in_p:
        x_c = jnp.pad(x_c, ((0, 0), (0, in_p - x.shape[1])))

    TB, vmem_limit = _plan_tiles(B, in_p, hid_p, out_p,
                                 jnp.dtype(compute_dtype).itemsize,
                                 jnp.dtype(compute_dtype).itemsize)
    grid = (pl.cdiv(B, TB),)

    flops = 2 * B * (in_p * hid_p + hid_p * out_p)
    bytes_accessed = (jnp.dtype(compute_dtype).itemsize
                      * (B * in_p + in_p * hid_p + hid_p * out_p)
                      + 4 * (hid_p + out_p) + 4 * B * out_p)

    tiled = lambda shape: pl.BlockSpec(shape, lambda i: (i, 0))      # moves w/ batch
    resident = lambda shape: pl.BlockSpec(shape, lambda i: (0, 0))   # VMEM-resident

    fused = pl.pallas_call(
        encoder_kernel,
        out_shape=jax.ShapeDtypeStruct((B, out_p), jnp.float32),
        grid=grid,
        in_specs=[
            tiled((TB, in_p)),            # x tile
            resident((in_p, hid_p)),      # W1
            resident((1, hid_p)),         # b1
            resident((hid_p, out_p)),     # fused W2 = [Wmu | Wvar]
            resident((1, out_p)),         # fused b2
        ],
        out_specs=tiled((TB, out_p)),     # lane-dense fused mu|var output
        compiler_params=pltpu.CompilerParams(
            dimension_semantics=("parallel",),
            vmem_limit_bytes=vmem_limit,
        ),
        cost_estimate=pl.CostEstimate(
            flops=flops, transcendentals=0, bytes_accessed=bytes_accessed),
    )(x_c, w1, b1, w2, b2)

    # Zero-cost split of the fused, lane-padded head back into (z_mu, z_var).
    z_mu = fused[:, :latent_dim]
    z_var = fused[:, latent_dim:2 * latent_dim]
    return z_mu, z_var


def encoder_forward(x, params):
    """x: [B, input_dim] -> (z_mu, z_var), each [B, latent_dim]."""
    return _encoder_forward_padded(x, params["w1"], params["b1"],
                                   params["w2"], params["b2"],
                                   latent_dim=params["latent_dim"])


# ---------------------------------------------------------------------------
# Reference & init (PyTorch nn.Linear semantics)
# ---------------------------------------------------------------------------
def init_linear_params(key, in_features, out_features, dtype=jnp.float32):
    kw, kb = jax.random.split(key)
    bound = 1.0 / (in_features ** 0.5)
    # Stored already transposed: [in, out]  (PyTorch stores [out, in]).
    w_t = jax.random.uniform(kw, (in_features, out_features), dtype, -bound, bound)
    b = jax.random.uniform(kb, (out_features,), dtype, -bound, bound)
    return w_t, b


def reference_forward(x, w1, b1, wmu, bmu, wvar, bvar):
    h = jnp.maximum(x @ w1 + b1, 0.0)
    # NOTE: the PyTorch module emits the raw linear output as z_var (no exp).
    return h @ wmu + bmu, h @ wvar + bvar


if __name__ == "__main__":
    batch, input_dim, hidden_dim, latent_dim = 8, 64, 32, 16

    key = jax.random.PRNGKey(0)
    kx, k1, k2, k3 = jax.random.split(key, 4)

    x = jax.random.normal(kx, (batch, input_dim), jnp.float32)
    w1, b1 = init_linear_params(k1, input_dim, hidden_dim)
    wmu, bmu = init_linear_params(k2, hidden_dim, latent_dim)
    wvar, bvar = init_linear_params(k3, hidden_dim, latent_dim)

    ref_mu, ref_var = reference_forward(x, w1, b1, wmu, bmu, wvar, bvar)

    # Production path: bf16 operands on the MXU, f32 accumulation.
    params_bf16 = prepare_encoder_params(w1, b1, wmu, bmu, wvar, bvar,
                                         compute_dtype=jnp.bfloat16)
    z_mu, z_var = encoder_forward(x, params_bf16)
    jax.block_until_ready((z_mu, z_var))
    assert z_mu.shape == (batch, latent_dim) and z_var.shape == (batch, latent_dim)
    assert jnp.allclose(z_mu, ref_mu, atol=3e-2, rtol=3e-2)
    assert jnp.allclose(z_var, ref_var, atol=3e-2, rtol=3e-2)

    # f32 path: tight match against the plain-JAX / PyTorch-equivalent reference.
    params_f32 = prepare_encoder_params(w1, b1, wmu, bmu, wvar, bvar,
                                        compute_dtype=jnp.float32)
    z_mu32, z_var32 = encoder_forward(x, params_f32)
    jax.block_until_ready((z_mu32, z_var32))
    assert jnp.allclose(z_mu32, ref_mu, atol=1e-5, rtol=1e-5)
    assert jnp.allclose(z_var32, ref_var, atol=1e-5, rtol=1e-5)

    print("KERNEL_OK")
</pallas_src>

<mosaic_0001>
module attributes {stable_mosaic.version = 11 : i64} {
  func.func @encoder_kernel(%arg0: i32, %arg1: memref<8x128xbf16, #tpu.memory_space<vmem>>, %arg2: memref<128x128xbf16, #tpu.memory_space<vmem>>, %arg3: memref<1x128xf32, #tpu.memory_space<vmem>>, %arg4: memref<128x128xbf16, #tpu.memory_space<vmem>>, %arg5: memref<1x128xf32, #tpu.memory_space<vmem>>, %arg6: memref<8x128xf32, #tpu.memory_space<vmem>>) attributes {dimension_semantics = [#tpu.dimension_semantics<parallel>], iteration_bounds = array<i64: 1>, scalar_prefetch = 0 : i64, scratch_operands = 0 : i64, tpu.core_type = #tpu.core_type<tc>, window_params = [{transform_indices = @transform_0, window_bounds = array<i64: 8, 128>}, {pipeline_mode = #tpu.pipeline_mode<synchronous>, transform_indices = @transform_1, window_bounds = array<i64: 128, 128>}, {pipeline_mode = #tpu.pipeline_mode<synchronous>, transform_indices = @transform_2, window_bounds = array<i64: 1, 128>}, {pipeline_mode = #tpu.pipeline_mode<synchronous>, transform_indices = @transform_3, window_bounds = array<i64: 128, 128>}, {pipeline_mode = #tpu.pipeline_mode<synchronous>, transform_indices = @transform_4, window_bounds = array<i64: 1, 128>}, {transform_indices = @transform_5, window_bounds = array<i64: 8, 128>}]} {
    %c0 = arith.constant 0 : index
    %c0_0 = arith.constant 0 : index
    %0 = vector.load %arg1[%c0, %c0_0] : memref<8x128xbf16, #tpu.memory_space<vmem>>, vector<8x128xbf16>
    %c0_1 = arith.constant 0 : index
    %c0_2 = arith.constant 0 : index
    %1 = vector.load %arg2[%c0_1, %c0_2] : memref<128x128xbf16, #tpu.memory_space<vmem>>, vector<128x128xbf16>
    %cst = arith.constant dense<0.000000e+00> : vector<8x128xf32>
    %2 = tpu.matmul %0, %1, %cst {dimension_numbers = #tpu.dot_dimension_numbers<[1], [0], [0], [1], [0, 0, 1, 1], [], []>} : vector<8x128xbf16>, vector<128x128xbf16>, vector<8x128xf32> -> vector<8x128xf32>
    %c0_3 = arith.constant 0 : index
    %c0_4 = arith.constant 0 : index
    %3 = vector.load %arg3[%c0_3, %c0_4] : memref<1x128xf32, #tpu.memory_space<vmem>>, vector<1x128xf32>
    %4 = vector.broadcast %3 : vector<1x128xf32> to vector<8x128xf32>
    %5 = arith.addf %2, %4 : vector<8x128xf32>
    %cst_5 = arith.constant 0.000000e+00 : f32
    %6 = vector.broadcast %cst_5 : f32 to vector<8x128xf32>
    %7 = arith.maximumf %5, %6 : vector<8x128xf32>
    %8 = arith.truncf %7 : vector<8x128xf32> to vector<8x128xbf16>
    %c0_6 = arith.constant 0 : index
    %c0_7 = arith.constant 0 : index
    %9 = vector.load %arg4[%c0_6, %c0_7] : memref<128x128xbf16, #tpu.memory_space<vmem>>, vector<128x128xbf16>
    %cst_8 = arith.constant dense<0.000000e+00> : vector<8x128xf32>
    %10 = tpu.matmul %8, %9, %cst_8 {dimension_numbers = #tpu.dot_dimension_numbers<[1], [0], [0], [1], [0, 0, 1, 1], [], []>} : vector<8x128xbf16>, vector<128x128xbf16>, vector<8x128xf32> -> vector<8x128xf32>
    %c0_9 = arith.constant 0 : index
    %c0_10 = arith.constant 0 : index
    %11 = vector.load %arg5[%c0_9, %c0_10] : memref<1x128xf32, #tpu.memory_space<vmem>>, vector<1x128xf32>
    %12 = vector.broadcast %11 : vector<1x128xf32> to vector<8x128xf32>
    %13 = arith.addf %10, %12 : vector<8x128xf32>
    %c0_11 = arith.constant 0 : index
    %c0_12 = arith.constant 0 : index
    %14 = vector.load %arg6[%c0_11, %c0_12] : memref<8x128xf32, #tpu.memory_space<vmem>>, vector<8x128xf32>
    tpu.vector_store %arg6[%c0_11, %c0_12], %13 {strides = array<i32>} : memref<8x128xf32, #tpu.memory_space<vmem>>, vector<8x128xf32>,
    return
  }
  func.func @transform_0(%arg0: i32) -> (i32, i32) {
    %c0_i32 = arith.constant 0 : i32
    %c0_i32_0 = arith.constant 0 : i32
    return %arg0, %c0_i32 : i32, i32
  }
  func.func @transform_1(%arg0: i32) -> (i32, i32) {
    %c0_i32 = arith.constant 0 : i32
    %c0_i32_0 = arith.constant 0 : i32
    %c0_i32_1 = arith.constant 0 : i32
    return %c0_i32, %c0_i32_0 : i32, i32
  }
  func.func @transform_2(%arg0: i32) -> (i32, i32) {
    %c0_i32 = arith.constant 0 : i32
    %c0_i32_0 = arith.constant 0 : i32
    %c0_i32_1 = arith.constant 0 : i32
    return %c0_i32, %c0_i32_0 : i32, i32
  }
  func.func @transform_3(%arg0: i32) -> (i32, i32) {
    %c0_i32 = arith.constant 0 : i32
    %c0_i32_0 = arith.constant 0 : i32
    %c0_i32_1 = arith.constant 0 : i32
    return %c0_i32, %c0_i32_0 : i32, i32
  }
  func.func @transform_4(%arg0: i32) -> (i32, i32) {
    %c0_i32 = arith.constant 0 : i32
    %c0_i32_0 = arith.constant 0 : i32
    %c0_i32_1 = arith.constant 0 : i32
    return %c0_i32, %c0_i32_0 : i32, i32
  }
  func.func @transform_5(%arg0: i32) -> (i32, i32) {
    %c0_i32 = arith.constant 0 : i32
    %c0_i32_0 = arith.constant 0 : i32
    return %arg0, %c0_i32 : i32, i32
  }
}

</mosaic_0001>

<bundles_post_ra>
// kernel: _encoder_forward_padded.1
= control target key start
LH: loop header
LB: loop body
LE: loop exit
PB: predicated region body
PF: predicated region fallthrough
CT: control target
= control target key end

     0   :  { %10 = vsyncpa [#allocation3], 0  ;;  %s414_s0 = inlined_call_operand.vmem [shape: bf16[8,128], index: 0, kind: input, shape index: {}]   ;;  %s415_s1 = inlined_call_operand.hbm [shape: bf16[128,128], index: 1, kind: input, shape index: {}]   ;;  %s416_s2 = inlined_call_operand.vmem [shape: f32[1,128], index: 2, kind: input, shape index: {}]   ;;  %s417_s3 = inlined_call_operand.hbm [shape: bf16[128,128], index: 3, kind: input, shape index: {}]   ;;  %s418_s4 = inlined_call_operand.vmem [shape: f32[1,128], index: 4, kind: input, shape index: {}]   ;;  %s419_s5 = inlined_call_operand.vmem [shape: f32[8,128], index: 5, kind: output, shape index: {}]  }
   0x1   :  { %s18_s20 = sshll.u32 %s415_s1, 4  ;;  %s19_s20 = int_to_ptr.hbm [resolvable:$true] %s18_s20 }
   0x2   :  { %11 = vsyncpa [#allocation5], 0  ;;  %s362_s21 = smov [#allocation2]   ;;  %s33_s25 = sshll.u32 %s417_s3, 4  ;;  %s34_s25 = int_to_ptr.hbm [resolvable:$true] %s33_s25 }
   0x3   :  { %s20_s22 = sshll.u32 %s362_s21, 4  ;;  %s363_s26 = smov 64   ;;  %s21_s22 = int_to_ptr.vmem [resolvable:$true] %s20_s22 }
   0x4   :  { %s364_s27 = smov 4   ;;  %s365_s28 = smov [#allocation4]  }
   0x5   :  { %26 = dma.hbm_to_vmem [thread:$0]  %s19_s20, 1024, %s21_s22, [#allocation3], %s363_s26, %s363_s26, %s364_s27  }
   0x6   :  { %s35_s29 = sshll.u32 %s365_s28, 4  ;;  %s36_s29 = int_to_ptr.vmem [resolvable:$true] %s35_s29 }
   0x7   :  { %41 = dma.hbm_to_vmem [thread:$0]  %s34_s25, 1024, %s36_s29, [#allocation5], %s363_s26, %s363_s26, %s364_s27  }
   0x8   :  { %358 = dma.done.wait [#allocation3], 1024  }
   0x9   :  { %359 = vsyncadd [#allocation3], 4294966272 }
   0xa   :  { %360 = dma.done.wait [#allocation5], 1024  }
   0xb   :  { %361 = vsyncadd [#allocation5], 4294966272  ;;  %v295_v0 = vld [vmem:[#allocation2 + $0x38] sm:$0xff]  ;;  %v294_v1 = vld [vmem:[#allocation2 + $0x30] sm:$0xff] }
   0xc   :  { %121 = vmatpush.bf16.msra.mxu0 %v295_v0  ;;  %v303_v2 = vld [vmem:[#allocation4 + $0x38] sm:$0xff]  ;;  %v302_v3 = vld [vmem:[#allocation4 + $0x30] sm:$0xff]  ;;  %v293_v4 = vld [vmem:[#allocation2 + $0x28] sm:$0xff] }
   0xd   :  { %204 = vmatpush.bf16.msra.mxu1 %v303_v2  ;;  %v301_v5 = vld [vmem:[#allocation4 + $0x28] sm:$0xff]  ;;  %v292_v6 = vld [vmem:[#allocation2 + $0x20] sm:$0xff]  ;;  %v291_v8 = vld [vmem:[#allocation2 + $0x18] sm:$0xff] }
   0xe   :  { %v300_v7 = vld [vmem:[#allocation4 + $0x20] sm:$0xff]  ;;  %v299_v9 = vld [vmem:[#allocation4 + $0x18] sm:$0xff]  ;;  %v290_v10 = vld [vmem:[#allocation2 + $0x10] sm:$0xff] }
   0xf   :  { %v298_v11 = vld [vmem:[#allocation4 + $0x10] sm:$0xff]  ;;  %v289_v12 = vld [vmem:[#allocation2 + $0x8] sm:$0xff]  ;;  %v288_v13 = vld [vmem:[#allocation2] sm:$0xff] }
  0x10   :  { %122 = vmatpush.bf16.msra.mxu0 %v294_v1  ;;  %v52_v14 = vld [vmem:[%s414_s0] sm:$0xf]  ;;  %v297_v15 = vld [vmem:[#allocation4 + $0x8] sm:$0xff] }
  0x11   :  { %205 = vmatpush.bf16.msra.mxu1 %v302_v3  ;;  %v296_v16 = vld [vmem:[#allocation4] sm:$0xff] }
  0x12   :  { %v308_v17 = vld [vmem:[%s416_s2] ss:$0 sm:$0xff] }
  0x13   :  { %v309_v23 = vld [vmem:[%s418_s4] ss:$0 sm:$0xff] }
  0x14   :  { %123 = vmatpush.bf16.msra.mxu0 %v293_v4 }
  0x15   :  { %206 = vmatpush.bf16.msra.mxu1 %v301_v5 }
  0x18   :  { %124 = vmatpush.bf16.msra.mxu0 %v292_v6 }
  0x19   :  { %207 = vmatpush.bf16.msra.mxu1 %v300_v7 }
  0x1c   :  { %125 = vmatpush.bf16.msra.mxu0 %v291_v8 }
  0x1d   :  { %208 = vmatpush.bf16.msra.mxu1 %v299_v9 }
  0x20   :  { %126 = vmatpush.bf16.msra.mxu0 %v290_v10 }
  0x21   :  { %209 = vmatpush.bf16.msra.mxu1 %v298_v11 }
  0x24   :  { %127 = vmatpush.bf16.msra.mxu0 %v289_v12 }
  0x25   :  { %210 = vmatpush.bf16.msra.mxu1 %v297_v15 }
  0x28   :  { %128 = vmatpush.bf16.msra.mxu0 %v288_v13 }
  0x29   :  { %211 = vmatpush.bf16.msra.mxu1 %v296_v16 }
  0x2b   :  { %129 = vmatmul.bf16.vlgmr.msra.gmra.mxu0 %v52_v14 }
  0xa8   :  { %v130_v18 = vpop.f32.mrf.mxu0 }
  0xa9   :  { %v131_v19 = vadd.f32 %v308_v17, %v130_v18 }
  0xab   :  { %v134_v20 = vmax.f32 %v131_v19, 0.0 }
  0xad   :  { %v135_v21 = vpack.c.bf16 %v134_v20, %v134_v20 }
  0xaf   :  { %212 = vmatmul.bf16.vlgmr.msra.gmra.mxu1 %v135_v21 }
  0xb0   :  { %v132_v22 = vpop.f32.mrf.mxu0 }
 0x12c   :  { %v213_v24 = vpop.f32.mrf.mxu1 }
 0x12d   :  { %v214_v25 = vadd.f32 %v309_v23, %v213_v24 }
 0x12f   :  { %217 = vst [vmem:[%s419_s5] sm:$0xff] %v214_v25 }
 0x134   :  { %v215_v26 = vpop.f32.mrf.mxu1 }
 0x135   :  { %222 = vsyncpa [#allocation3], 1 }
 0x136   :  { %223 = vsyncpa [#allocation5], 1 }

</bundles_post_ra>
